<compile_context>
chip_gen: v7x
topology: tpu7x:2x2x1
jax: 0.10.0
libtpu: 0.0.40
codegen_flags: <defaults>
</compile_context>

<pallas_src>
import functools

import jax
import jax.numpy as jnp
from jax.experimental import pallas as pl
from jax.experimental.pallas import tpu as pltpu

_EPS = 1e-5


# ---------------------------------------------------------------------------
# Per-generation configuration (VMEM budget, epilogue dtype).
# ---------------------------------------------------------------------------
@functools.lru_cache(maxsize=None)
def _tpu_config():
    try:
        kind = jax.devices()[0].device_kind.lower()
    except Exception:  # pragma: no cover - defensive
        kind = ""
    if "v7" in kind:
        vmem_limit = 48 * 1024 * 1024          # 64 MiB physical -> leave headroom
    elif "v6" in kind or "v5" in kind:
        vmem_limit = 96 * 1024 * 1024          # 128 MiB physical
    else:
        vmem_limit = 32 * 1024 * 1024          # conservative default
    bf16_epilogue = ("v6" in kind) or ("v7" in kind)   # bf16-capable VPU
    return vmem_limit, bf16_epilogue


def _pick_tile_rows(H, W, c_in, c_hid, c_out, budget_bytes):
    """Largest row-slab TH with TH | H, (TH*W) % 128 == 0, fitting the VMEM budget.
    Prefers >= 2 slabs so the pipeline has something to overlap."""
    cands = [th for th in range(1, H + 1) if H % th == 0 and (th * W) % 128 == 0]
    if not cands:
        return H                                # block == full array is always legal

    def per_step_bytes(th):
        lanes = th * W
        ext = lanes + 2 * W + (-(lanes + 2 * W)) % 128
        work = 5 * c_hid * ext * 4              # h, h_l, h_r, acc, temporaries (f32 bound)
        io = 2 * ((c_in + c_out) * lanes * 4 + c_in * 2 * W * 4)   # double-buffered blocks
        return work + io

    good = [th for th in cands if per_step_bytes(th) <= budget_bytes] or [min(cands)]
    multi = [th for th in good if H // th >= 2]
    return max(multi) if multi else max(good)


# ---------------------------------------------------------------------------
# Pallas kernel: fc1 -> dwconv3x3 -> ReLU -> fc2 for one (batch, row-slab) tile.
# ---------------------------------------------------------------------------
def _mlp_kernel(x_ref, halo_ref, w1_ref, kdw_ref, bias_ref, w2_ref, b2_ref,
                out_ref, *, width, tile_rows, compute_dtype):
    w = width
    thw = tile_rows * w
    pad = (-(thw + 2 * w)) % 128                 # keep the extended slab lane-aligned
    ext = thw + 2 * w + pad
    cdt = compute_dtype

    # ---- fc1 (1x1 conv, BN folded) on [top halo row | slab | bottom halo row] ----
    x_t = x_ref[0].astype(jnp.bfloat16)                     # (C_in, thw)
    x_h = halo_ref[0].astype(jnp.bfloat16)                  # (C_in, 2w)
    pieces = [x_h[:, :w], x_t, x_h[:, w:]]
    if pad:
        pieces.append(jnp.zeros((x_t.shape[0], pad), jnp.bfloat16))
    x_ext = jnp.concatenate(pieces, axis=1)                 # (C_in, ext)

    h = jnp.dot(w1_ref[...], x_ext, preferred_element_type=jnp.float32)
    bias = bias_ref[...]                                    # (C_hid, 2) f32
    h = h + bias[:, 0:1]                                    # folded-BN bias

    # Zero halo lanes that fall outside the image (conv zero padding) and the pad tail.
    q = jax.lax.broadcasted_iota(jnp.int32, (1, ext), 1)
    t = pl.program_id(1)
    nt = pl.num_programs(1)
    valid = (q >= w) & (q < w + thw)
    valid |= (q < w) & (t > 0)
    valid |= (q >= w + thw) & (q < 2 * w + thw) & (t < nt - 1)
    h = jnp.where(valid, h, 0.0).astype(cdt)                # (C_hid, ext)

    # ---- depthwise 3x3 + bias: column-masked +-1 lane shifts, row offsets as slices ----
    qf = q.astype(jnp.float32)
    col = qf - jnp.floor(qf / w) * w                        # lane index within an image row
    h_l = jnp.where(col > 0.5, jnp.roll(h, 1, axis=1), 0)        # left neighbour, edge-masked
    h_r = jnp.where(col < w - 1.5, jnp.roll(h, -1, axis=1), 0)   # right neighbour, edge-masked
    cols = (h_l, h, h_r)

    kdw = kdw_ref[...]                                      # (C_hid, 9)
    acc = bias[:, 1:2]                                      # dw-conv bias, f32 accumulator
    for di in range(3):                                     # row offset -1 / 0 / +1
        for dj in range(3):                                 # col offset -1 / 0 / +1
            tap = cols[dj][:, di * w: di * w + thw]         # (C_hid, thw)
            acc = acc + tap * kdw[:, di * 3 + dj: di * 3 + dj + 1]

    h2 = jnp.maximum(acc, 0.0).astype(jnp.bfloat16)         # ReLU; Dropout(p=0) is identity

    # ---- fc2 (1x1 conv, BN folded) ----
    y = jnp.dot(w2_ref[...], h2, preferred_element_type=jnp.float32)
    out_ref[0] = y + b2_ref[...]                            # lane-dense f32 store


# ---------------------------------------------------------------------------
# Wrapper
# ---------------------------------------------------------------------------
def _fold_bn(w, bn, eps=_EPS):
    """Fold eval-mode BatchNorm into the preceding bias-free 1x1 conv (f32, cast later)."""
    gamma, beta, mean, var = bn
    scale = gamma / jnp.sqrt(var + eps)
    return w * scale[:, None], beta - mean * scale


def _build_halo(x, tile_rows):
    """Rows directly above / below each TH-row slab (zeros at the image border).
    Returns (B*T, C_in, 2W): lanes [0, W) = row above, [W, 2W) = row below."""
    B, C, H, W = x.shape
    T = H // tile_rows
    zero = jnp.zeros((B, C, 1, W), x.dtype)
    above = jnp.concatenate(
        [zero, x[:, :, tile_rows - 1::tile_rows, :][:, :, :T - 1, :]], axis=2)
    below = jnp.concatenate([x[:, :, tile_rows::tile_rows, :], zero], axis=2)
    halo = jnp.concatenate([above, below], axis=3)          # (B, C, T, 2W)
    return jnp.transpose(halo, (0, 2, 1, 3)).reshape(B * T, C, 2 * W)


def mlp_forward(x, params):
    """x: (B, C_in, H, W) NCHW float32 -> (B, C_out, H, W) float32."""
    B, C_in, H, W = x.shape
    C_hid = params["w1"].shape[0]
    C_out = params["w2"].shape[0]
    HW = H * W

    vmem_limit, bf16_epi = _tpu_config()
    cdt = jnp.bfloat16 if bf16_epi else jnp.float32
    TH = _pick_tile_rows(H, W, C_in, C_hid, C_out, budget_bytes=vmem_limit // 2)
    T = H // TH
    thw = TH * W

    w1, b1 = _fold_bn(params["w1"], params["bn1"])           # (C_hid, C_in), (C_hid,)
    w2, b2 = _fold_bn(params["w2"], params["bn2"])           # (C_out, C_hid), (C_out,)
    kdw = params["dw_w"].reshape(C_hid, 9).astype(cdt)       # lane-packed dw taps
    bias12 = jnp.stack([b1, params["dw_b"]], axis=1)         # (C_hid, 2): [fc1 bias | dw bias]

    x2 = x.reshape(B, C_in, HW)                              # pure reshape, stays f32
    halo = _build_halo(x, TH)                                # (B*T, C_in, 2W) f32

    kernel = functools.partial(_mlp_kernel, width=W, tile_rows=TH, compute_dtype=cdt)
    const = lambda b, t: (0, 0)

    out = pl.pallas_call(
        kernel,
        out_shape=jax.ShapeDtypeStruct((B, C_out, HW), jnp.float32),
        grid=(B, T),
        in_specs=[
            pl.BlockSpec((1, C_in, thw), lambda b, t: (b, 0, t)),            # x slab (f32)
            pl.BlockSpec((1, C_in, 2 * W), lambda b, t, T=T: (b * T + t, 0, 0)),  # row halo
            pl.BlockSpec((C_hid, C_in), const),                              # fc1 weight (bf16)
            pl.BlockSpec((C_hid, 9), const),                                 # dw taps
            pl.BlockSpec((C_hid, 2), const),                                 # [fc1 bias | dw bias]
            pl.BlockSpec((C_out, C_hid), const),                             # fc2 weight (bf16)
            pl.BlockSpec((C_out, 1), const),                                 # fc2 bias
        ],
        out_specs=pl.BlockSpec((1, C_out, thw), lambda b, t: (b, 0, t)),
        compiler_params=pltpu.CompilerParams(
            dimension_semantics=("parallel", "parallel"),
            vmem_limit_bytes=vmem_limit,
        ),
    )(x2, halo,
      w1.astype(jnp.bfloat16), kdw, bias12,
      w2.astype(jnp.bfloat16), b2[:, None])

    return out.reshape(B, C_out, H, W)


# ---------------------------------------------------------------------------
# Deterministic parameter init (raw PyTorch-style params; BN folded at call).
# ---------------------------------------------------------------------------
def init_params(key, c_in, c_hidden, c_out):
    ks = jax.random.split(key, 6)

    def bn_params(k, n):
        kg, kb, km, kv = jax.random.split(k, 4)
        gamma = 1.0 + 0.1 * jax.random.normal(kg, (n,), jnp.float32)
        beta = 0.1 * jax.random.normal(kb, (n,), jnp.float32)
        mean = 0.1 * jax.random.normal(km, (n,), jnp.float32)
        var = jnp.abs(jax.random.normal(kv, (n,), jnp.float32)) + 0.5
        return gamma, beta, mean, var

    return {
        "w1": 0.3 * jax.random.normal(ks[0], (c_hidden, c_in), jnp.float32),
        "bn1": bn_params(ks[1], c_hidden),
        "dw_w": 0.2 * jax.random.normal(ks[2], (c_hidden, 1, 3, 3), jnp.float32),
        "dw_b": 0.1 * jax.random.normal(ks[3], (c_hidden,), jnp.float32),
        "w2": 0.2 * jax.random.normal(ks[4], (c_out, c_hidden), jnp.float32),
        "bn2": bn_params(ks[5], c_out),
    }


# ---------------------------------------------------------------------------
# Pure-JAX f32 reference (faithful to the PyTorch module, NCHW)
# ---------------------------------------------------------------------------
def mlp_reference(x, params, eps=_EPS):
    def conv1x1_bn(z, w, bn):
        gamma, beta, mean, var = bn
        y = jnp.einsum("oi,bihw->bohw", w, z, precision="highest")
        scale = gamma / jnp.sqrt(var + eps)
        return (y * scale[None, :, None, None]
                + (beta - mean * scale)[None, :, None, None])

    h = conv1x1_bn(x, params["w1"], params["bn1"])
    h = jax.lax.conv_general_dilated(
        h, params["dw_w"], window_strides=(1, 1), padding=((1, 1), (1, 1)),
        dimension_numbers=("NCHW", "OIHW", "NCHW"),
        feature_group_count=h.shape[1], precision=jax.lax.Precision.HIGHEST)
    h = h + params["dw_b"][None, :, None, None]
    h = jnp.maximum(h, 0.0)
    return conv1x1_bn(h, params["w2"], params["bn2"])


if __name__ == "__main__":
    B, C_in, C_hidden = 2, 4, 32
    C_out = C_in                      # Mlp default: out_features = in_features
    H = W = 16                        # -> 2 row-slabs of 8 rows, grid (2, 2)

    key = jax.random.PRNGKey(0)
    k_x, k_p = jax.random.split(key)
    x = jax.random.normal(k_x, (B, C_in, H, W), jnp.float32)
    params = init_params(k_p, C_in, C_hidden, C_out)

    out = mlp_forward(x, params)
    out = jax.block_until_ready(out)

    ref = mlp_reference(x, params)
    assert out.shape == (B, C_out, H, W)
    # bf16 MXU operands (f32 accumulate) vs f32 reference.
    assert jnp.allclose(out, ref, rtol=5e-2, atol=5e-2), \
        float(jnp.max(jnp.abs(out - ref)))
    print("KERNEL_OK")
</pallas_src>

<mosaic_0001>
module attributes {stable_mosaic.version = 11 : i64} {
  func.func @_mlp_kernel(%arg0: i32, %arg1: i32, %arg2: memref<1x4x128xf32, #tpu.memory_space<vmem>>, %arg3: memref<1x4x32xf32, #tpu.memory_space<vmem>>, %arg4: memref<32x4xbf16, #tpu.memory_space<vmem>>, %arg5: memref<32x9xf32, #tpu.memory_space<vmem>>, %arg6: memref<32x2xf32, #tpu.memory_space<vmem>>, %arg7: memref<4x32xbf16, #tpu.memory_space<vmem>>, %arg8: memref<4x1xf32, #tpu.memory_space<vmem>>, %arg9: memref<1x4x128xf32, #tpu.memory_space<vmem>>) attributes {dimension_semantics = [#tpu.dimension_semantics<parallel>, #tpu.dimension_semantics<parallel>], iteration_bounds = array<i64: 2, 2>, scalar_prefetch = 0 : i64, scratch_operands = 0 : i64, tpu.core_type = #tpu.core_type<tc>, window_params = [{transform_indices = @transform_0, window_bounds = array<i64: 1, 4, 128>}, {transform_indices = @transform_1, window_bounds = array<i64: 1, 4, 32>}, {pipeline_mode = #tpu.pipeline_mode<synchronous>, transform_indices = @transform_2, window_bounds = array<i64: 32, 4>}, {pipeline_mode = #tpu.pipeline_mode<synchronous>, transform_indices = @transform_3, window_bounds = array<i64: 32, 9>}, {pipeline_mode = #tpu.pipeline_mode<synchronous>, transform_indices = @transform_4, window_bounds = array<i64: 32, 2>}, {pipeline_mode = #tpu.pipeline_mode<synchronous>, transform_indices = @transform_5, window_bounds = array<i64: 4, 32>}, {pipeline_mode = #tpu.pipeline_mode<synchronous>, transform_indices = @transform_6, window_bounds = array<i64: 4, 1>}, {transform_indices = @transform_7, window_bounds = array<i64: 1, 4, 128>}]} {
    %c0 = arith.constant 0 : index
    %c0_0 = arith.constant 0 : index
    %c0_1 = arith.constant 0 : index
    %0 = vector.load %arg2[%c0, %c0_0, %c0_1] : memref<1x4x128xf32, #tpu.memory_space<vmem>>, vector<1x4x128xf32>
    %1 = vector.shape_cast %0 : vector<1x4x128xf32> to vector<4x128xf32>
    %2 = arith.truncf %1 : vector<4x128xf32> to vector<4x128xbf16>
    %c0_2 = arith.constant 0 : index
    %c0_3 = arith.constant 0 : index
    %c0_4 = arith.constant 0 : index
    %3 = vector.load %arg3[%c0_2, %c0_3, %c0_4] : memref<1x4x32xf32, #tpu.memory_space<vmem>>, vector<1x4x32xf32>
    %4 = vector.shape_cast %3 : vector<1x4x32xf32> to vector<4x32xf32>
    %5 = arith.truncf %4 : vector<4x32xf32> to vector<4x32xbf16>
    %6 = vector.extract_strided_slice %5 {offsets = [0, 0], sizes = [4, 16], strides = [1, 1]} : vector<4x32xbf16> to vector<4x16xbf16>
    %7 = vector.extract_strided_slice %5 {offsets = [0, 16], sizes = [4, 16], strides = [1, 1]} : vector<4x32xbf16> to vector<4x16xbf16>
    %cst = arith.constant 0.000000e+00 : bf16
    %8 = vector.broadcast %cst : bf16 to vector<4x96xbf16>
    %9 = tpu.concatenate %6, %2, %7, %8 in 1 : vector<4x16xbf16>, vector<4x128xbf16>, vector<4x16xbf16>, vector<4x96xbf16> -> vector<4x256xbf16>
    %c0_5 = arith.constant 0 : index
    %c0_6 = arith.constant 0 : index
    %10 = vector.load %arg4[%c0_5, %c0_6] : memref<32x4xbf16, #tpu.memory_space<vmem>>, vector<32x4xbf16>
    %cst_7 = arith.constant dense<0.000000e+00> : vector<32x256xf32>
    %11 = tpu.matmul %10, %9, %cst_7 {dimension_numbers = #tpu.dot_dimension_numbers<[1], [0], [0], [1], [0, 0, 1, 1], [], []>} : vector<32x4xbf16>, vector<4x256xbf16>, vector<32x256xf32> -> vector<32x256xf32>
    %c0_8 = arith.constant 0 : index
    %c0_9 = arith.constant 0 : index
    %12 = vector.load %arg6[%c0_8, %c0_9] : memref<32x2xf32, #tpu.memory_space<vmem>>, vector<32x2xf32>
    %13 = vector.extract_strided_slice %12 {offsets = [0, 0], sizes = [32, 1], strides = [1, 1]} : vector<32x2xf32> to vector<32x1xf32>
    %14 = vector.broadcast %13 : vector<32x1xf32> to vector<32x256xf32>
    %15 = arith.addf %11, %14 : vector<32x256xf32>
    %16 = tpu.iota {dimensions = array<i32: 1>} : vector<1x256xi32>
    %c16_i32 = arith.constant 16 : i32
    %17 = vector.broadcast %c16_i32 : i32 to vector<1x256xi32>
    %18 = arith.cmpi sge, %16, %17 : vector<1x256xi32>
    %c144_i32 = arith.constant 144 : i32
    %19 = vector.broadcast %c144_i32 : i32 to vector<1x256xi32>
    %20 = arith.cmpi slt, %16, %19 : vector<1x256xi32>
    %21 = arith.andi %18, %20 : vector<1x256xi1>
    %c16_i32_10 = arith.constant 16 : i32
    %22 = vector.broadcast %c16_i32_10 : i32 to vector<1x256xi32>
    %23 = arith.cmpi slt, %16, %22 : vector<1x256xi32>
    %c0_i32 = arith.constant 0 : i32
    %24 = arith.cmpi sgt, %arg1, %c0_i32 : i32
    %25 = vector.broadcast %24 : i1 to vector<1x256xi1>
    %26 = arith.andi %23, %25 : vector<1x256xi1>
    %27 = arith.ori %21, %26 : vector<1x256xi1>
    %c144_i32_11 = arith.constant 144 : i32
    %28 = vector.broadcast %c144_i32_11 : i32 to vector<1x256xi32>
    %29 = arith.cmpi sge, %16, %28 : vector<1x256xi32>
    %c160_i32 = arith.constant 160 : i32
    %30 = vector.broadcast %c160_i32 : i32 to vector<1x256xi32>
    %31 = arith.cmpi slt, %16, %30 : vector<1x256xi32>
    %32 = arith.andi %29, %31 : vector<1x256xi1>
    %c1_i32 = arith.constant 1 : i32
    %33 = arith.cmpi slt, %arg1, %c1_i32 : i32
    %34 = vector.broadcast %33 : i1 to vector<1x256xi1>
    %35 = arith.andi %32, %34 : vector<1x256xi1>
    %36 = arith.ori %27, %35 : vector<1x256xi1>
    %cst_12 = arith.constant 0.000000e+00 : f32
    %37 = vector.shape_cast %36 : vector<1x256xi1> to vector<1x256xi1>
    %38 = vector.broadcast %37 : vector<1x256xi1> to vector<32x256xi1>
    %39 = vector.broadcast %cst_12 : f32 to vector<32x256xf32>
    %40 = arith.select %38, %15, %39 : vector<32x256xi1>, vector<32x256xf32>
    %41 = arith.sitofp %16 : vector<1x256xi32> to vector<1x256xf32>
    %cst_13 = arith.constant 1.600000e+01 : f32
    %42 = vector.broadcast %cst_13 : f32 to vector<1x256xf32>
    %43 = arith.divf %41, %42 : vector<1x256xf32>
    %44 = math.floor %43 : vector<1x256xf32>
    %cst_14 = arith.constant 1.600000e+01 : f32
    %45 = vector.broadcast %cst_14 : f32 to vector<1x256xf32>
    %46 = arith.mulf %44, %45 : vector<1x256xf32>
    %47 = arith.subf %41, %46 : vector<1x256xf32>
    %cst_15 = arith.constant 5.000000e-01 : f32
    %48 = vector.broadcast %cst_15 : f32 to vector<1x256xf32>
    %49 = arith.cmpf ogt, %47, %48 : vector<1x256xf32>
    %50 = vector.extract_strided_slice %40 {offsets = [0, 255], sizes = [32, 1], strides = [1, 1]} : vector<32x256xf32> to vector<32x1xf32>
    %51 = vector.extract_strided_slice %40 {offsets = [0, 0], sizes = [32, 255], strides = [1, 1]} : vector<32x256xf32> to vector<32x255xf32>
    %52 = tpu.concatenate %50, %51 in 1 : vector<32x1xf32>, vector<32x255xf32> -> vector<32x256xf32>
    %c0_i32_16 = arith.constant 0 : i32
    %53 = arith.sitofp %c0_i32_16 : i32 to f32
    %54 = vector.shape_cast %49 : vector<1x256xi1> to vector<1x256xi1>
    %55 = vector.broadcast %54 : vector<1x256xi1> to vector<32x256xi1>
    %56 = vector.broadcast %53 : f32 to vector<32x256xf32>
    %57 = arith.select %55, %52, %56 : vector<32x256xi1>, vector<32x256xf32>
    %cst_17 = arith.constant 1.450000e+01 : f32
    %58 = vector.broadcast %cst_17 : f32 to vector<1x256xf32>
    %59 = arith.cmpf olt, %47, %58 : vector<1x256xf32>
    %60 = vector.extract_strided_slice %40 {offsets = [0, 1], sizes = [32, 255], strides = [1, 1]} : vector<32x256xf32> to vector<32x255xf32>
    %61 = vector.extract_strided_slice %40 {offsets = [0, 0], sizes = [32, 1], strides = [1, 1]} : vector<32x256xf32> to vector<32x1xf32>
    %62 = tpu.concatenate %60, %61 in 1 : vector<32x255xf32>, vector<32x1xf32> -> vector<32x256xf32>
    %c0_i32_18 = arith.constant 0 : i32
    %63 = arith.sitofp %c0_i32_18 : i32 to f32
    %64 = vector.shape_cast %59 : vector<1x256xi1> to vector<1x256xi1>
    %65 = vector.broadcast %64 : vector<1x256xi1> to vector<32x256xi1>
    %66 = vector.broadcast %63 : f32 to vector<32x256xf32>
    %67 = arith.select %65, %62, %66 : vector<32x256xi1>, vector<32x256xf32>
    %c0_19 = arith.constant 0 : index
    %c0_20 = arith.constant 0 : index
    %68 = vector.load %arg5[%c0_19, %c0_20] : memref<32x9xf32, #tpu.memory_space<vmem>>, vector<32x9xf32>
    %69 = vector.extract_strided_slice %12 {offsets = [0, 1], sizes = [32, 1], strides = [1, 1]} : vector<32x2xf32> to vector<32x1xf32>
    %70 = vector.extract_strided_slice %57 {offsets = [0, 0], sizes = [32, 128], strides = [1, 1]} : vector<32x256xf32> to vector<32x128xf32>
    %71 = vector.extract_strided_slice %68 {offsets = [0, 0], sizes = [32, 1], strides = [1, 1]} : vector<32x9xf32> to vector<32x1xf32>
    %72 = vector.broadcast %71 : vector<32x1xf32> to vector<32x128xf32>
    %73 = arith.mulf %70, %72 : vector<32x128xf32>
    %74 = vector.broadcast %69 : vector<32x1xf32> to vector<32x128xf32>
    %75 = arith.addf %74, %73 : vector<32x128xf32>
    %76 = vector.extract_strided_slice %40 {offsets = [0, 0], sizes = [32, 128], strides = [1, 1]} : vector<32x256xf32> to vector<32x128xf32>
    %77 = vector.extract_strided_slice %68 {offsets = [0, 1], sizes = [32, 1], strides = [1, 1]} : vector<32x9xf32> to vector<32x1xf32>
    %78 = vector.broadcast %77 : vector<32x1xf32> to vector<32x128xf32>
    %79 = arith.mulf %76, %78 : vector<32x128xf32>
    %80 = arith.addf %75, %79 : vector<32x128xf32>
    %81 = vector.extract_strided_slice %67 {offsets = [0, 0], sizes = [32, 128], strides = [1, 1]} : vector<32x256xf32> to vector<32x128xf32>
    %82 = vector.extract_strided_slice %68 {offsets = [0, 2], sizes = [32, 1], strides = [1, 1]} : vector<32x9xf32> to vector<32x1xf32>
    %83 = vector.broadcast %82 : vector<32x1xf32> to vector<32x128xf32>
    %84 = arith.mulf %81, %83 : vector<32x128xf32>
    %85 = arith.addf %80, %84 : vector<32x128xf32>
    %86 = vector.extract_strided_slice %57 {offsets = [0, 16], sizes = [32, 128], strides = [1, 1]} : vector<32x256xf32> to vector<32x128xf32>
    %87 = vector.extract_strided_slice %68 {offsets = [0, 3], sizes = [32, 1], strides = [1, 1]} : vector<32x9xf32> to vector<32x1xf32>
    %88 = vector.broadcast %87 : vector<32x1xf32> to vector<32x128xf32>
    %89 = arith.mulf %86, %88 : vector<32x128xf32>
    %90 = arith.addf %85, %89 : vector<32x128xf32>
    %91 = vector.extract_strided_slice %40 {offsets = [0, 16], sizes = [32, 128], strides = [1, 1]} : vector<32x256xf32> to vector<32x128xf32>
    %92 = vector.extract_strided_slice %68 {offsets = [0, 4], sizes = [32, 1], strides = [1, 1]} : vector<32x9xf32> to vector<32x1xf32>
    %93 = vector.broadcast %92 : vector<32x1xf32> to vector<32x128xf32>
    %94 = arith.mulf %91, %93 : vector<32x128xf32>
    %95 = arith.addf %90, %94 : vector<32x128xf32>
    %96 = vector.extract_strided_slice %67 {offsets = [0, 16], sizes = [32, 128], strides = [1, 1]} : vector<32x256xf32> to vector<32x128xf32>
    %97 = vector.extract_strided_slice %68 {offsets = [0, 5], sizes = [32, 1], strides = [1, 1]} : vector<32x9xf32> to vector<32x1xf32>
    %98 = vector.broadcast %97 : vector<32x1xf32> to vector<32x128xf32>
    %99 = arith.mulf %96, %98 : vector<32x128xf32>
    %100 = arith.addf %95, %99 : vector<32x128xf32>
    %101 = vector.extract_strided_slice %57 {offsets = [0, 32], sizes = [32, 128], strides = [1, 1]} : vector<32x256xf32> to vector<32x128xf32>
    %102 = vector.extract_strided_slice %68 {offsets = [0, 6], sizes = [32, 1], strides = [1, 1]} : vector<32x9xf32> to vector<32x1xf32>
    %103 = vector.broadcast %102 : vector<32x1xf32> to vector<32x128xf32>
    %104 = arith.mulf %101, %103 : vector<32x128xf32>
    %105 = arith.addf %100, %104 : vector<32x128xf32>
    %106 = vector.extract_strided_slice %40 {offsets = [0, 32], sizes = [32, 128], strides = [1, 1]} : vector<32x256xf32> to vector<32x128xf32>
    %107 = vector.extract_strided_slice %68 {offsets = [0, 7], sizes = [32, 1], strides = [1, 1]} : vector<32x9xf32> to vector<32x1xf32>
    %108 = vector.broadcast %107 : vector<32x1xf32> to vector<32x128xf32>
    %109 = arith.mulf %106, %108 : vector<32x128xf32>
    %110 = arith.addf %105, %109 : vector<32x128xf32>
    %111 = vector.extract_strided_slice %67 {offsets = [0, 32], sizes = [32, 128], strides = [1, 1]} : vector<32x256xf32> to vector<32x128xf32>
    %112 = vector.extract_strided_slice %68 {offsets = [0, 8], sizes = [32, 1], strides = [1, 1]} : vector<32x9xf32> to vector<32x1xf32>
    %113 = vector.broadcast %112 : vector<32x1xf32> to vector<32x128xf32>
    %114 = arith.mulf %111, %113 : vector<32x128xf32>
    %115 = arith.addf %110, %114 : vector<32x128xf32>
    %cst_21 = arith.constant 0.000000e+00 : f32
    %116 = vector.broadcast %cst_21 : f32 to vector<32x128xf32>
    %117 = arith.maximumf %115, %116 : vector<32x128xf32>
    %118 = arith.truncf %117 : vector<32x128xf32> to vector<32x128xbf16>
    %c0_22 = arith.constant 0 : index
    %c0_23 = arith.constant 0 : index
    %119 = vector.load %arg7[%c0_22, %c0_23] : memref<4x32xbf16, #tpu.memory_space<vmem>>, vector<4x32xbf16>
    %cst_24 = arith.constant dense<0.000000e+00> : vector<4x128xf32>
    %120 = tpu.matmul %119, %118, %cst_24 {dimension_numbers = #tpu.dot_dimension_numbers<[1], [0], [0], [1], [0, 0, 1, 1], [], []>} : vector<4x32xbf16>, vector<32x128xbf16>, vector<4x128xf32> -> vector<4x128xf32>
    %c0_25 = arith.constant 0 : index
    %c0_26 = arith.constant 0 : index
    %121 = vector.load %arg8[%c0_25, %c0_26] : memref<4x1xf32, #tpu.memory_space<vmem>>, vector<4x1xf32>
    %122 = vector.broadcast %121 : vector<4x1xf32> to vector<4x128xf32>
    %123 = arith.addf %120, %122 : vector<4x128xf32>
    %c0_27 = arith.constant 0 : index
    %c0_28 = arith.constant 0 : index
    %c0_29 = arith.constant 0 : index
    %124 = vector.load %arg9[%c0_27, %c0_28, %c0_29] : memref<1x4x128xf32, #tpu.memory_space<vmem>>, vector<1x4x128xf32>
    %125 = vector.shape_cast %124 : vector<1x4x128xf32> to vector<4x128xf32>
    %126 = vector.shape_cast %123 : vector<4x128xf32> to vector<1x4x128xf32>
    tpu.vector_store %arg9[%c0_27, %c0_28, %c0_29], %126 {strides = array<i32>} : memref<1x4x128xf32, #tpu.memory_space<vmem>>, vector<1x4x128xf32>,
    return
  }
  func.func @transform_0(%arg0: i32, %arg1: i32) -> (i32, i32, i32) {
    %c0_i32 = arith.constant 0 : i32
    %c0_i32_0 = arith.constant 0 : i32
    return %arg0, %c0_i32, %arg1 : i32, i32, i32
  }
  func.func @transform_1(%arg0: i32, %arg1: i32) -> (i32, i32, i32) {
    %c2_i32 = arith.constant 2 : i32
    %0 = arith.muli %arg0, %c2_i32 : i32
    %1 = arith.addi %0, %arg1 : i32
    %c0_i32 = arith.constant 0 : i32
    %c0_i32_0 = arith.constant 0 : i32
    %c0_i32_1 = arith.constant 0 : i32
    return %1, %c0_i32, %c0_i32_0 : i32, i32, i32
  }
  func.func @transform_2(%arg0: i32, %arg1: i32) -> (i32, i32) {
    %c0_i32 = arith.constant 0 : i32
    %c0_i32_0 = arith.constant 0 : i32
    %c0_i32_1 = arith.constant 0 : i32
    return %c0_i32, %c0_i32_0 : i32, i32
  }
  func.func @transform_3(%arg0: i32, %arg1: i32) -> (i32, i32) {
    %c0_i32 = arith.constant 0 : i32
    %c0_i32_0 = arith.constant 0 : i32
    %c0_i32_1 = arith.constant 0 : i32
    return %c0_i32, %c0_i32_0 : i32, i32
  }
  func.func @transform_4(%arg0: i32, %arg1: i32) -> (i32, i32) {
    %c0_i32 = arith.constant 0 : i32
    %c0_i32_0 = arith.constant 0 : i32
    %c0_i32_1 = arith.constant 0 : i32
    return %c0_i32, %c0_i32_0 : i32, i32
  }
  func.func @transform_5(%arg0: i32, %arg1: i32) -> (i32, i32) {
    %c0_i32 = arith.constant 0 : i32
    %c0_i32_0 = arith.constant 0 : i32
    %c0_i32_1 = arith.constant 0 : i32
    return %c0_i32, %c0_i32_0 : i32, i32
  }
  func.func @transform_6(%arg0: i32, %arg1: i32) -> (i32, i32) {
    %c0_i32 = arith.constant 0 : i32
    %c0_i32_0 = arith.constant 0 : i32
    %c0_i32_1 = arith.constant 0 : i32
    return %c0_i32, %c0_i32_0 : i32, i32
  }
  func.func @transform_7(%arg0: i32, %arg1: i32) -> (i32, i32, i32) {
    %c0_i32 = arith.constant 0 : i32
    %c0_i32_0 = arith.constant 0 : i32
    return %arg0, %c0_i32, %arg1 : i32, i32, i32
  }
}

</mosaic_0001>

<bundles_post_ra>
// kernel: tpu_custom_call.1
= control target key start
LH: loop header
LB: loop body
LE: loop exit
PB: predicated region body
PF: predicated region fallthrough
CT: control target
= control target key end

     0   :  { %12 = vsyncpa [#allocation3], 0  ;;  %s2172_s0 = inlined_call_operand.vmem [shape: f32[2,4,256], index: 0, kind: input, shape index: {}]   ;;  %s2173_s1 = inlined_call_operand.vmem [shape: f32[4,4,32], index: 1, kind: input, shape index: {}]   ;;  %s2174_s2 = inlined_call_operand.vmem [shape: bf16[32,4], index: 2, kind: input, shape index: {}]   ;;  %s2175_s3 = inlined_call_operand.vmem [shape: f32[32,9], index: 3, kind: input, shape index: {}]   ;;  %s2176_s4 = inlined_call_operand.vmem [shape: f32[32,2], index: 4, kind: input, shape index: {}]   ;;  %s2177_s5 = inlined_call_operand.vmem [shape: bf16[4,32], index: 5, kind: input, shape index: {}]   ;;  %s2178_s6 = inlined_call_operand.vmem [shape: f32[4,1], index: 6, kind: input, shape index: {}]   ;;  %s2179_s7 = inlined_call_operand.hbm [shape: f32[2,4,256], index: 7, kind: output, shape index: {}]  }
   0x1   :  { %14 = vsyncpa [#allocation3 + $0x1], 0  ;;  %s1544_s24 = smov 0   ;;  %s1546_s25 = smov 0  }
   0x2   :  { %s1548_s26 = smov 0   ;;  %s1550_s27 = smov 0  }
   0x3   :  { %s1552_s28 = smov 0   ;;  %s1554_s29 = smov 0  }
   0x4   :  { %s1556_s30 = smov 0   ;;  %s1558_s8 = smov 0  }
   0x5 LB: > { %s1239_s9 = sadd.s32 4294967295, %s1485_s8   ;;  %s1240_s10 = sadd.s32 4294967294, %s1485_s8   ;;  %s1485_s8 = sphi %s1558_s8, %s20_s8   ;;  %s1481_s30 = sphi %s1556_s30, %s2198_s30   ;;  %s1477_s29 = sphi %s1554_s29, %s2197_s29   ;;  %s1473_s28 = sphi %s1552_s28, %s2196_s28   ;;  %s1469_s27 = sphi %s1550_s27, %s2195_s27   ;;  %s1465_s26 = sphi %s1548_s26, %s2194_s26   ;;  %s1461_s25 = sphi %s1546_s25, %s2193_s25   ;;  %s1457_s24 = sphi %s1544_s24, %s2192_s24  }
   0x6   : > { %s29_s11 = sadd.s32 1, %s1477_s29  ;;  %s32_s12 = sadd.s32 1, %s1481_s30 }
   0x7   : > { %p30_p0 = scmp.ge.s32.totalorder %s29_s11, 2  ;;  %p214_p1 = scmp.ne.s32.totalorder %s1465_s26, %s1461_s25 }
   0x8   : > { %p215_p2 = scmp.eq.s32.totalorder %s1239_s9, 3  ;;  %p220_p5 = scmp.ne.s32.totalorder %s1461_s25, %s1457_s24 }
   0x9   : > { %s2200_s11 = smov (%p30_p0, %s29_s11), 0  ;;  %s2202_s12 = smov (!%p30_p0, %s32_s12), %s1481_s30 }
   0xa   : > { %2182 = sst [smem:[#allocation5_spill]] %s2200_s11  ;;  %s200_s13 = ssub.s32 %s1477_s29, %s2200_s11 }
   0xb   : > { %p1595_p3 = por %p215_p2, %p214_p1  ;;  %p34_p4 = scmp.ge.s32.totalorder %s2202_s12, 2 }
   0xc   : > { %p221_p6 = scmp.eq.s32.totalorder %s1240_s10, 3  ;;  %p1245_p7 = scmp.ge.s32.totalorder %s1485_s8, 1 }
   0xd   : > { %s2204_s12 = smov (%p34_p4, %s2202_s12), 0  ;;  %p276_p9 = scmp.lt.s32.totalorder %s1485_s8, 5 }
   0xe   : > { %2184 = sst [smem:[#allocation6_spill]] %s2204_s12  ;;  %p1604_p8 = por %p221_p6, %p220_p5 }
   0xf   : > { %s199_s16 = ssub.s32 %s1481_s30, %s2204_s12  ;;  %s204_s17 = sadd.s32 1, %s1465_s26 }
  0x10   : > { %s201_s18 = sor.u32 %s200_s13, %s199_s16  ;;  %p277_p10 = pnand %p1245_p7, %p276_p9 }
  0x11   : > { %p202_p11 = scmp.eq.s32.totalorder %s201_s18, 0  ;;  %p317_p12 = scmp.lt.s32.totalorder (!%p277_p10), %s1473_s28, 1  ;;  %v1620_v0 = vld [vmem:[%s2176_s4 + $0x8] sm:$0xff] (!%p277_p10)  ;;  %v1487_v1 = vmov (!%p277_p10), 0   ;;  %v1633_v2 = vld [vmem:[%s2176_s4 + $0x10] sm:$0xff] (!%p277_p10)  ;;  %v1642_v3 = vld [vmem:[%s2176_s4 + $0x18] sm:$0xff] (!%p277_p10)  ;;  %v452_v34 = vlaneseq (!%p277_p10) }
  0x12   : > { %280 = sbr.rel (%p277_p10) target bundleno = 910 (0x38e), region = 48  ;;  %p319_p13 = scmp.lt.s32.totalorder (!%p277_p10), %s1469_s27, 1  ;;  %1361 = vset.pattern.permute.xlu1 (!%p277_p10), %v1487_v1  ;;  %431 = vmatprep.mubr.bf16.mxu0 (!%p277_p10), %v1487_v1  ;;  %v1648_v6 = vld [vmem:[%s2175_s3 + $0x8] sm:$0xff] (!%p277_p10)  ;;  %v1653_v7 = vld [vmem:[%s2176_s4] sm:$0xff] (!%p277_p10)  ;;  %v1489_v8 = vmov (!%p277_p10), 3   ;;  %v1490_v10 = vmov (!%p277_p10), 4  }
  0x13   : > { %s1613_s19 = scalar_select %p202_p11, %s1465_s26, %s204_s17  }
  0x14   : > { %364 = vperm.xlu1 (!%p277_p10), %1361, %v1620_v0   ;;  %1360 = vset.pattern.permute.xlu0 (!%p277_p10), %v1487_v1  ;;  %s1488_s9 = smov (!%p277_p10), 16   ;;  %v1660_v9 = vld [vmem:[%s2175_s3] sm:$0xff] (!%p277_p10)  ;;  %v1667_v11 = vld [vmem:[%s2175_s3 + $0x10] sm:$0xff] (!%p277_p10)  ;;  %v1674_v12 = vld [vmem:[%s2175_s3 + $0x18] sm:$0xff] (!%p277_p10)  ;;  %v1491_v13 = vmov (!%p277_p10), 5   ;;  %v1492_v14 = vmov (!%p277_p10), 7  }
  0x15   : > { %v1493_v15 = vmov (!%p277_p10), 6   ;;  %v1494_v16 = vmov (!%p277_p10), 8   ;;  %v1495_v17 = vmov (!%p277_p10), 1   ;;  %v1496_v18 = vmov (!%p277_p10), 2   ;;  %v1389_v26 = vld [vmem:[%s2174_s2] sm:$0xff] (!%p277_p10)   ;;  %v1390_v27 = vld [vmem:[%s2174_s2 + $0x8] sm:$0xff] (!%p277_p10)  }
  0x16   : > { %vm341_vm0 = vcmask (!%p277_p10), 130048   ;;  %vm346_vm1 = vcmask (!%p277_p10), 261120   ;;  %vm394_vm2 = vcmask (!%p277_p10), 1041408   ;;  %vm387_vm3 = vcmask (!%p277_p10), 31744   ;;  %p463_p1 = scmp.gt.s32.totalorder (!%p277_p10), %s1469_s27, 0  ;;  %s314_s12 = sand.u32 (!%p277_p10), 1, %s1461_s25  }
  0x17   : > { %v1744_v36 = vand.u32 (!%p277_p10), 127, %v452_v34 }
  0x18   : > { %369 = vperm.xlu1 (!%p277_p10), %1361, %v1633_v2  }
  0x19   : > { %s318_s22 = scalar_select %p317_p12, %s1473_s28, 1  ;;  %v1751_v38 = vadd.s32 128, %v1744_v36  ;;  %vm461_vm6 = vcmp.lt.s32.totalorder %v1744_v36, 16  ;;  %vm455_vm10 = vcmp.ge.s32.totalorder %v1744_v36, 16 }
  0x1a   : > { %s320_s23 = scalar_select %p319_p13, %s1469_s27, 1 }
  0x1b   : > { %s1247_s13 = sshll.u32 %s318_s22, 1  ;;  %vm472_vm4 = vcmp.ge.s32.totalorder %v1751_v38, 144  ;;  %vm474_vm5 = vcmp.lt.s32.totalorder %v1751_v38, 160  ;;  %vm458_vm12 = vcmp.lt.s32.totalorder %v1751_v38, 144 }
  0x1c   : > { %s322_s16 = sadd.s32 %s1247_s13, %s320_s23  ;;  %374 = vperm.xlu1 %1361, %v1642_v3   ;;  %vm476_vm8 = vmand %vm472_vm4, %vm474_vm5  ;;  %vm585_vm4 = vcmask 1039360  }
  0x1d   : > { %s1248_s17 = sshll.u32 %s322_s16, 2  ;;  %s1246_s16 = sshll.u32 %s314_s12, 2 }
  0x1e   : > { %s324_s21 = scalar_lea.vmem %s2172_s0, %s1248_s17 }
  0x1f   : > { %v334_v4 = vld [vmem:[%s324_s21] sm:$0xf]  ;;  %s1249_s21 = sshll.u32 %s1473_s28, 1  ;;  %s1503_s28 = smov [#allocation2]  }
  0x20   : > { %v335_v5 = vpack.c.bf16 %v334_v4, %v334_v4  ;;  %1363 = vset.pattern.permute.xlu1 %v1489_v8  ;;  %s464_s18 = scalar_select %p463_p1, 1, 0 }
  0x21   : > { %719 = vperm.xlu1 %1363, %v1648_v6   ;;  %s478_s20 = scalar_select %p319_p13, 1, 0 }
  0x22   : > { %339 = vrot.lane.b32.xlu0 %v335_v5, %s1488_s9  ;;  %s1709_s9 = sadd.s32 %s1469_s27, %s1249_s21  ;;  %v465_v39 = vstv %s464_s18  ;;  %s1497_s27 = smov 127  }
  0x23   : > { %p327_p0 = scmp.lt.s32.totalorder %s1709_s9, 3  ;;  %v479_v41 = vstv %s478_s20  ;;  %vm466_vm7 = vcmp.eq.s32.totalorder %v465_v39, 1  ;;  %s1498_s21 = smov 1  }
  0x24   : > { %vm480_vm9 = vcmp.eq.s32.totalorder %v479_v41, 1  ;;  %vm467_vm11 = vmand %vm461_vm6, %vm466_vm7  ;;  %vm762_vm7 = vcmask 916480   ;;  %s1259_s17 = sshll.u32 %s1709_s9, 6  ;;  %s316_s18 = scalar_lea.vmem [#allocation2], %s1246_s16 }
  0x25   : > { %1364 = vset.pattern.permute.xlu1 %v1490_v10  ;;  %s328_s22 = scalar_select %p327_p0, %s1709_s9, 3  ;;  %vm482_vm13 = vmand %vm476_vm8, %vm480_vm9  ;;  %vm943_vm8 = vcmask 785408   ;;  %vm1502_vm9 = vmmov 0  }
  0x26   : > { %359 = vperm.xlu0 %1360, %v1653_v7   ;;  %776 = vperm.xlu1 %1364, %v1660_v9   ;;  %vm1764_vm14 = vmor %vm455_vm10, %vm467_vm11  ;;  %s1149_s20 = sshll.u32 %s316_s18, 4  ;;  %s1134_s9 = scalar_lea.sflag [#allocation3], %s314_s12  ;;  %s2121_s20 = int_to_ptr.vmem [resolvable:$true] %s1149_s20 }
  0x27   : > { %s1250_s23 = sshll.u32 %s328_s22, 2  ;;  %vm1768_vm15 = vmor %vm458_vm12, %vm482_vm13  ;;  %s1499_s22 = smov 112  }
  0x28   : > { %s330_s13 = scalar_lea.vmem %s2173_s1, %s1250_s23  ;;  %s1500_s23 = smov 96  }
  0x29   : > { %v336_v19 = vld [vmem:[%s330_s13] sm:$0xf]  ;;  %s1395_s10 = sshll.u32 %s1503_s28, 4  ;;  %s1396_s10 = int_to_ptr.vmem [resolvable:$false] %s1395_s10 }
  0x2a   : > { %1362 = vset.pattern.permute.xlu0 %v1489_v8  ;;  %1366 = vset.pattern.permute.xlu1 %v1489_v8  ;;  %v337_v20 = vpack.c.bf16 %v336_v19, %v336_v19  ;;  %s1397_s13 = scalar_lea.vmem %s1396_s10, 128  ;;  %p1398_p6 = scmp.lt.s32.totalorder %s2121_s20, %s1396_s10 }
  0x2b   : > { %715 = vperm.xlu0 %1362, %v1660_v9   ;;  %723 = vperm.xlu1 %1366, %v1667_v11  }
  0x2f   : > { %1365 = vset.pattern.permute.xlu0 %v1490_v10  ;;  %727 = vperm.xlu1 %1366, %v1674_v12  }
  0x30   : > { %780 = vperm.xlu0 %1365, %v1648_v6  }
  0x33   : > { %1367 = vset.pattern.permute.xlu1 %v1491_v13 }
  0x34   : > { %788 = vperm.xlu0 %1365, %v1674_v12   ;;  %840 = vperm.xlu1 %1367, %v1648_v6  }
  0x38   : > { %1369 = vset.pattern.permute.xlu0 %v1491_v13  ;;  %1368 = vset.pattern.permute.xlu1 %v1490_v10 }
  0x39   : > { %836 = vperm.xlu0 %1369, %v1660_v9   ;;  %784 = vperm.xlu1 %1368, %v1667_v11  }
  0x3d   : > { %844 = vperm.xlu0 %1369, %v1667_v11   ;;  %1370 = vset.pattern.permute.xlu1 %v1493_v15 }
  0x3e   : > { %896 = vperm.xlu1 %1370, %v1660_v9  }
  0x41   : > { %1373 = vset.pattern.permute.xlu0 %v1492_v14 }
  0x42   : > { %961 = vperm.xlu0 %1373, %v1648_v6   ;;  %900 = vperm.xlu1 %1370, %v1648_v6  }
  0x46   : > { %1374 = vset.pattern.permute.xlu0 %v1493_v15  ;;  %1371 = vset.pattern.permute.xlu1 %v1491_v13 }
  0x47   : > { %904 = vperm.xlu0 %1374, %v1667_v11   ;;  %848 = vperm.xlu1 %1371, %v1674_v12  }
  0x4b   : > { %1377 = vset.pattern.permute.xlu0 %v1494_v16  ;;  %1372 = vset.pattern.permute.xlu1 %v1492_v14 }
  0x4c   : > { %1021 = vperm.xlu0 %1377, %v1648_v6   ;;  %957 = vperm.xlu1 %1372, %v1660_v9  }
  0x50   : > { %1025 = vperm.xlu0 %1377, %v1667_v11   ;;  %1375 = vset.pattern.permute.xlu1 %v1493_v15 }
  0x51   : > { %908 = vperm.xlu1 %1375, %v1674_v12  }
  0x54   : > { %1382 = vset.pattern.permute.xlu0 %v1495_v17 }
  0x55   : > { %651 = vperm.xlu0 %1382, %v1620_v0   ;;  %1376 = vset.pattern.permute.xlu1 %v1494_v16 }
  0x56   : > { %1017 = vperm.xlu1 %1376, %v1660_v9  }
  0x59   : > { %675 = vperm.xlu0 %1382, %v1667_v11  }
  0x5a   : > { %1378 = vset.pattern.permute.xlu1 %v1492_v14 }
  0x5b   : > { %965 = vperm.xlu1 %1378, %v1667_v11  }
  0x5d   : > { %1386 = vset.pattern.permute.xlu0 %v1496_v18 }
  0x5e   : > { %695 = vperm.xlu0 %1386, %v1648_v6  }
  0x5f   : > { %969 = vperm.xlu1 %1378, %v1674_v12  }
  0x62   : > { %703 = vperm.xlu0 %1386, %v1674_v12  }
  0x63   : > { %1379 = vset.pattern.permute.xlu1 %v1494_v16 }
  0x64   : > { %1029 = vperm.xlu1 %1379, %v1674_v12  }
  0x66   : > { %1388 = vset.pattern.permute.xlu0 %v1487_v1 }
  0x67   : > { %624 = vperm.xlu0 %1388, %v1660_v9  }
  0x68   : > { %1380 = vset.pattern.permute.xlu1 %v1487_v1 }
  0x69   : > { %629 = vperm.xlu1 %1380, %v1648_v6  }
  0x6b   : > { %634 = vperm.xlu0 %1388, %v1667_v11  }
  0x6d   : > { %1381 = vset.pattern.permute.xlu1 %v1495_v17 }
  0x6e   : > { %647 = vperm.xlu1 %1381, %v1653_v7  }
  0x72   : > { %667 = vperm.xlu1 %1381, %v1660_v9  }
  0x76   : > { %671 = vperm.xlu1 %1381, %v1648_v6  }
  0x7a   : > { %1383 = vset.pattern.permute.xlu1 %v1487_v1 }
  0x7b   : > { %639 = vperm.xlu1 %1383, %v1674_v12  }
  0x7f   : > { %1384 = vset.pattern.permute.xlu1 %v1496_v18 }
  0x80   : > { %691 = vperm.xlu1 %1384, %v1660_v9  }
  0x84   : > { %1385 = vset.pattern.permute.xlu1 %v1495_v17 }
  0x85   : > { %655 = vperm.xlu1 %1385, %v1633_v2  }
  0x89   : > { %659 = vperm.xlu1 %1385, %v1642_v3  }
  0x8d   : > { %679 = vperm.xlu1 %1385, %v1674_v12  }
  0x91   : > { %1387 = vset.pattern.permute.xlu1 %v1496_v18 }
  0x92   : > { %699 = vperm.xlu1 %1387, %v1667_v11  }
  0x93   : > { %v365_v28 = vpop.permute.xlu1 %364 }
  0x94   : > { %v340_v21 = vpop.permute.xlu0 %339 }
  0x95   : > { %v345_v22 = vsel %vm341_vm0, %v340_v21, %v337_v20  ;;  %v344_v23 = vsel %vm341_vm0, %v337_v20, %v340_v21  ;;  %vm538_vm0 = vcmask 7168  }
  0x96   : > { %v348_v24 = vsel %vm346_vm1, %v345_v22, 0  ;;  %v395_v25 = vsel %vm394_vm2, %v344_v23, 0 }
  0x97   : > { %1253 = vmatprep.subr.msk.bf16.mxu0 %vm394_vm2, %v348_v24  ;;  %v1731_v29 = vpop.permute.xlu1 %369 }
  0x98   : > { %400 = vmatpush1.bf16.msra.mxu0 %v395_v25 }
  0x9b   : > { %1254 = vmatmul.mubr.msk.bf16.vlgmr.msra.gmra.mrb[0].mxu0 %vm387_vm3, %v1389_v26  ;;  %v1733_v30 = vpop.permute.xlu1 %374 }
  0x9c   : > { %441 = vmatprep.mubr.bf16.mxu0 %v1487_v1 }
  0xa0   : > { %v1735_v31 = vpop.permute.xlu1 %719 }
  0xa3   : > { %1255 = vmatmul.mubr.msk.bf16.gmra.mrb[4].mxu0 %vm387_vm3, %v1390_v27 }
  0xa5   : > { %v1737_v32 = vpop.permute.xlu1 %776  ;;  %v360_v40 = vpop.permute.xlu0 %359 }
  0xaa   : > { %v1739_v33 = vpop.permute.xlu1 %723  ;;  %v1759_v43 = vpop.permute.xlu0 %715 }
  0xae   : > { %v1741_v35 = vpop.permute.xlu1 %727 }
  0xaf   : > { %v781_v55 = vpop.permute.xlu0 %780 }
  0xb3   : > { %v1746_v37 = vpop.permute.xlu1 %840  ;;  %v1793_v63 = vpop.permute.xlu0 %788 }
  0xb8   : > { %v1755_v42 = vpop.permute.xlu1 %784  ;;  %v1810_v9 = vpop.permute.xlu0 %836 }
  0xbc   : > { %v1816_v13 = vpop.permute.xlu0 %844 }
  0xbd   : > { %v1762_v44 = vpop.permute.xlu1 %896 }
  0xc1   : > { %v1782_v58 = vpop.permute.xlu1 %900  ;;  %v962_v16 = vpop.permute.xlu0 %961 }
  0xc6   : > { %v1796_v2 = vpop.permute.xlu1 %848 }
  0xcb   : > { %v958_v8 = vpop.permute.xlu1 %957 }
  0xd0   : > { %v1823_v17 = vpop.permute.xlu1 %908 }
  0xd5   : > { %v1833_v22 = vpop.permute.xlu1 %1017 }
  0xda   : > { %v966_v24 = vpop.permute.xlu1 %965 }
  0xde   : > { %v970_v27 = vpop.permute.xlu1 %969 }
 0x16e   : > { %v433_v45 = vpop.f32.mrb[0].mxu0 }
 0x16f   : > { %v434_v47 = vadd.f32 %v433_v45, %v360_v40  ;;  %v435_v48 = vpop.f32.mrb[1].mxu0  ;;  %v1871_v45 = vpop.permute.xlu0 %904 }
 0x170   : > { %v436_v50 = vadd.f32 %v435_v48, %v360_v40  ;;  %v437_v51 = vpop.f32.mrb[2].mxu0 }
 0x171   : > { %v1774_v52 = vsel %vm1764_vm14, %v434_v47, 0.0  ;;  %v438_v53 = vadd.f32 %v437_v51, %v365_v28  ;;  %v439_v54 = vpop.f32.mrb[3].mxu0 }
 0x172   : > { %v490_v56 = vsel %vm1768_vm15, %v436_v50, 0.0  ;;  %v440_v57 = vadd.f32 %v439_v54, %v365_v28  ;;  %569 = vrot.lane.b32.xlu0 %v1774_v52, %s1497_s27  ;;  %530 = vrot.lane.b32.xlu1 %v1774_v52, %s1498_s21  ;;  %v791_v7 = vmul.f32 %v1737_v32, %v1774_v52  ;;  %v972_v11 = vmul.f32 %v958_v8, %v1774_v52 }
 0x173   : > { %v1788_v60 = vsel %vm1764_vm14, %v438_v53, 0.0  ;;  %v792_v10 = vmul.f32 %v1737_v32, %v490_v56  ;;  %v973_v12 = vmul.f32 %v958_v8, %v490_v56  ;;  %v1874_v48 = vpop.permute.xlu0 %1021 }
 0x174   : > { %v492_v59 = vsel %vm1768_vm15, %v440_v57, 0.0  ;;  %v793_v15 = vmul.f32 %v781_v55, %v1788_v60  ;;  %v974_v19 = vmul.f32 %v962_v16, %v1788_v60 }
 0x175   : > { %v794_v14 = vmul.f32 %v781_v55, %v492_v59  ;;  %v975_v18 = vmul.f32 %v962_v16, %v492_v59 }
 0x176   : > { %v443_v61 = vpop.f32.mrb[4].mxu0  ;;  %532 = vrot.lane.b32.xlu0 %v1788_v60, %s1498_s21  ;;  %514 = vrot.lane.b32.xlu1 %v490_v56, %s1498_s21 }
 0x177   : > { %v445_v62 = vpop.f32.mrb[5].mxu0  ;;  %v444_v20 = vadd.f32 %v443_v61, %v1731_v29  ;;  %v1878_v50 = vpop.permute.xlu0 %1025  ;;  %v497_v61 = vcvt.s32.f32 %v1744_v36 }
 0x178   : > { %v446_v0 = vadd.f32 %v445_v62, %v1731_v29  ;;  %v447_v1 = vpop.f32.mrb[6].mxu0  ;;  %v1857_v29 = vpop.permute.xlu1 %1029 }
 0x179   : > { %v449_v3 = vpop.f32.mrb[7].mxu0  ;;  %v1831_v21 = vsel %vm1764_vm14, %v444_v20, 0.0  ;;  %v448_v23 = vadd.f32 %v447_v1, %v1733_v30 }
 0x17a   : > { %v494_v4 = vsel %vm1768_vm15, %v446_v0, 0.0  ;;  %v450_v5 = vadd.f32 %v449_v3, %v1733_v30  ;;  %573 = vrot.lane.b32.xlu0 %v1788_v60, %s1497_s27  ;;  %571 = vrot.lane.b32.xlu1 %v490_v56, %s1497_s27  ;;  %v795_v26 = vmul.f32 %v1755_v42, %v1831_v21  ;;  %v976_v28 = vmul.f32 %v966_v24, %v1831_v21 }
 0x17b   : > { %v1844_v25 = vsel %vm1764_vm14, %v448_v23, 0.0  ;;  %v796_v30 = vmul.f32 %v1755_v42, %v494_v4  ;;  %v977_v34 = vmul.f32 %v966_v24, %v494_v4  ;;  %v1882_v53 = vpop.permute.xlu0 %651  ;;  %v500_v0 = vmul.f32 0.0625, %v497_v61 }
 0x17c   : > { %v496_v6 = vsel %vm1768_vm15, %v450_v5, 0.0  ;;  %v797_v32 = vmul.f32 %v1793_v63, %v1844_v25  ;;  %v978_v39 = vmul.f32 %v970_v27, %v1844_v25  ;;  %v1865_v40 = vpop.permute.xlu1 %629 }
 0x17d   : > { %v798_v41 = vmul.f32 %v1793_v63, %v496_v6  ;;  %v979_v46 = vmul.f32 %v970_v27, %v496_v6  ;;  %v498_v63 = vcvt.s32.f32 %v1751_v38  ;;  %v502_v5 = vfloor.f32 %v500_v0 }
 0x17e   : > { %575 = vrot.lane.b32.xlu1 %v492_v59, %s1497_s27  ;;  %807 = vrot.lane.b32.xlu0 %v791_v7, %s1499_s22 }
 0x17f   : > { %v1884_v55 = vpop.permute.xlu0 %675  ;;  %v501_v3 = vmul.f32 0.0625, %v498_v63 }
 0x180   : > { %v648_v42 = vpop.permute.xlu1 %647 }
 0x182   : > { %809 = vrot.lane.b32.xlu1 %v792_v10, %s1499_s22  ;;  %988 = vrot.lane.b32.xlu0 %v972_v11, %s1500_s23  ;;  %v504_v10 = vmul.f32 16.0, %v502_v5 }
 0x183   : > { %v1886_v56 = vpop.permute.xlu0 %695 }
 0x184   : > { %v668_v47 = vpop.permute.xlu1 %667 }
 0x186   : > { %990 = vrot.lane.b32.xlu1 %v973_v12, %s1500_s23  ;;  %516 = vrot.lane.b32.xlu0 %v492_v59, %s1498_s21  ;;  %v1902_v12 = vsub.f32 %v497_v61, %v504_v10 }
 0x187   : > { %v1890_v59 = vpop.permute.xlu0 %703 }
 0x188   : > { %v1876_v49 = vpop.permute.xlu1 %671  ;;  %vm508_vm2 = vcmp.gt.f32.partialorder %v1902_v12, 0.5  ;;  %vm567_vm5 = vcmp.lt.f32.partialorder %v1902_v12, 14.5 }
 0x18a   : > { %813 = vrot.lane.b32.xlu1 %v794_v14, %s1499_s22  ;;  %811 = vrot.lane.b32.xlu0 %v793_v15, %s1499_s22 }
 0x18b   : > { %v625_v1 = vpop.permute.xlu0 %624 }
 0x18c   : > { %v1880_v51 = vpop.permute.xlu1 %639 }
 0x18e   : > { %994 = vrot.lane.b32.xlu1 %v975_v18, %s1500_s23  ;;  %992 = vrot.lane.b32.xlu0 %v974_v19, %s1500_s23 }
 0x18f   : > { %v1900_v8 = vpop.permute.xlu0 %634 }
 0x190   : > { %v692_v54 = vpop.permute.xlu1 %691 }
 0x192   : > { %518 = vrot.lane.b32.xlu1 %v494_v4, %s1498_s21  ;;  %534 = vrot.lane.b32.xlu0 %v1831_v21, %s1498_s21 }
 0x194   : > { %v1888_v57 = vpop.permute.xlu1 %655 }
 0x196   : > { %579 = vrot.lane.b32.xlu1 %v494_v4, %s1497_s27  ;;  %577 = vrot.lane.b32.xlu0 %v1831_v21, %s1497_s27 }
 0x198   : > { %v1893_v62 = vpop.permute.xlu1 %659 }
 0x19a   : > { %536 = vrot.lane.b32.xlu1 %v1844_v25, %s1498_s21  ;;  %581 = vrot.lane.b32.xlu0 %v1844_v25, %s1497_s27 }
 0x19c   : > { %v1896_v4 = vpop.permute.xlu1 %679 }
 0x19e   : > { %520 = vrot.lane.b32.xlu1 %v496_v6, %s1498_s21  ;;  %815 = vrot.lane.b32.xlu0 %v795_v26, %s1499_s22 }
 0x1a0   : > { %v1898_v7 = vpop.permute.xlu1 %699 }
 0x1a2   : > { %583 = vrot.lane.b32.xlu1 %v496_v6, %s1497_s27  ;;  %996 = vrot.lane.b32.xlu0 %v976_v28, %s1500_s23  ;;  %v503_v6 = vfloor.f32 %v501_v3 }
 0x1a4   : > { %v505_v11 = vmul.f32 16.0, %v503_v6 }
 0x1a6   : > { %817 = vrot.lane.b32.xlu1 %v796_v30, %s1499_s22  ;;  %819 = vrot.lane.b32.xlu0 %v797_v32, %s1499_s22  ;;  %v1904_v15 = vsub.f32 %v498_v63, %v505_v11 }
 0x1a8   : > { %vm509_vm3 = vcmp.gt.f32.partialorder %v1904_v15, 0.5  ;;  %vm568_vm6 = vcmp.lt.f32.partialorder %v1904_v15, 14.5 }
 0x1aa   : > { %998 = vrot.lane.b32.xlu1 %v977_v34, %s1500_s23  ;;  %1000 = vrot.lane.b32.xlu0 %v978_v39, %s1500_s23 }
 0x1ae   : > { %821 = vrot.lane.b32.xlu1 %v798_v41, %s1499_s22  ;;  %v682_v41 = vmul.f32 %v668_v47, %v1774_v52 }
 0x1b2   : > { %1002 = vrot.lane.b32.xlu1 %v979_v46, %s1500_s23 }
 0x1e4   : > { %v531_v36 = vpop.permute.xlu1 %530  ;;  %v570_v14 = vpop.permute.xlu0 %569 }
 0x1e8   : > { %v515_v38 = vpop.permute.xlu1 %514  ;;  %v533_v16 = vpop.permute.xlu0 %532 }
 0x1e9   : > { %v539_v18 = vsel %vm538_vm0, %v531_v36, %v515_v38  ;;  %v551_v19 = vsel %vm538_vm0, %v515_v38, %v531_v36 }
 0x1ea   : > { %v559_v20 = vsel %vm508_vm2, %v551_v19, 0.0  ;;  %v560_v26 = vsel %vm509_vm3, %v539_v18, 0.0 }
 0x1eb   : > { %v642_v23 = vmul.f32 %v625_v1, %v559_v20  ;;  %v730_v24 = vmul.f32 %v1759_v43, %v559_v20  ;;  %v731_v46 = vmul.f32 %v1759_v43, %v560_v26  ;;  %v911_v43 = vmul.f32 %v1762_v44, %v559_v20 }
 0x1ec   : > { %v572_v27 = vpop.permute.xlu1 %571  ;;  %v574_v28 = vpop.permute.xlu0 %573  ;;  %v912_v10 = vmul.f32 %v1762_v44, %v560_v26 }
 0x1ed   : > { %v662_v30 = vadd.f32 %v648_v42, %v642_v23  ;;  %v586_v32 = vsel %vm585_vm4, %v570_v14, %v572_v27  ;;  %v602_v34 = vsel %vm585_vm4, %v572_v27, %v570_v14  ;;  %746 = vrot.lane.b32.xlu1 %v730_v24, %s1499_s22 }
 0x1ee   : > { %v610_v39 = vsel %vm567_vm5, %v586_v32, 0.0  ;;  %v611_v42 = vsel %vm568_vm6, %v602_v34, 0.0  ;;  %v683_v32 = vmul.f32 %v1876_v49, %v1788_v60 }
 0x1ef   : > { %v706_v61 = vmul.f32 %v692_v54, %v610_v39  ;;  %v851_v63 = vmul.f32 %v1810_v9, %v610_v39  ;;  %v686_v3 = vadd.f32 %v682_v41, %v662_v30  ;;  %v852_v52 = vmul.f32 %v1810_v9, %v611_v42 }
 0x1f0   : > { %v576_v0 = vpop.permute.xlu1 %575  ;;  %v808_v1 = vpop.permute.xlu0 %807  ;;  %v1032_v11 = vmul.f32 %v1833_v22, %v610_v39  ;;  %v1033_v20 = vmul.f32 %v1833_v22, %v611_v42 }
 0x1f1   : > { %748 = vrot.lane.b32.xlu1 %v731_v46, %s1499_s22  ;;  %867 = vrot.lane.b32.xlu0 %v851_v63, %s1499_s22  ;;  %v1929_v5 = vadd.f32 %v706_v61, %v686_v3  ;;  %v587_v36 = vsel %vm585_vm4, %v574_v28, %v576_v0  ;;  %v603_v34 = vsel %vm585_vm4, %v576_v0, %v574_v28 }
 0x1f2   : > { %v612_v26 = vsel %vm567_vm5, %v587_v36, 0.0  ;;  %v613_v60 = vsel %vm568_vm6, %v603_v34, 0.0 }
 0x1f3   : > { %v853_v46 = vmul.f32 %v1746_v37, %v612_v26 }
 0x1f4   : > { %v810_v47 = vpop.permute.xlu1 %809  ;;  %v989_v54 = vpop.permute.xlu0 %988 }
 0x1f5   : > { %v1934_v6 = vsel %vm762_vm7, %v808_v1, %v810_v47  ;;  %869 = vrot.lane.b32.xlu1 %v852_v52, %s1499_s22  ;;  %927 = vrot.lane.b32.xlu0 %v911_v43, %s1500_s23  ;;  %v1501_v52 = vmov 0.0   ;;  %v1034_v47 = vmul.f32 %v1874_v48, %v612_v26 }
 0x1f6   : > { %1265 = vmatprep.subr.bf16.mxu1 %v1501_v52  ;;  %1269 = vmatprep.mubr.msk.bf16.mxu1 %vm1502_vm9, %v1501_v52 }
 0x1f8   : > { %v991_v14 = vpop.permute.xlu1 %990  ;;  %v517_v9 = vpop.permute.xlu0 %516 }
 0x1f9   : > { %v1942_v38 = vsel %vm943_vm8, %v989_v54, %v991_v14  ;;  %v540_v18 = vsel %vm538_vm0, %v533_v16, %v517_v9  ;;  %v552_v19 = vsel %vm538_vm0, %v517_v9, %v533_v16  ;;  %929 = vrot.lane.b32.xlu1 %v912_v10, %s1500_s23  ;;  %1048 = vrot.lane.b32.xlu0 %v1032_v11, %s1500_s23 }
 0x1fa   : > { %v561_v44 = vsel %vm508_vm2, %v552_v19, 0.0  ;;  %v562_v27 = vsel %vm509_vm3, %v540_v18, 0.0  ;;  %v684_v9 = vmul.f32 %v1884_v55, %v1831_v21 }
 0x1fb   : > { %v643_v23 = vmul.f32 %v1865_v40, %v561_v44  ;;  %v732_v24 = vmul.f32 %v1735_v31, %v561_v44  ;;  %v707_v40 = vmul.f32 %v1886_v56, %v612_v26  ;;  %v733_v41 = vmul.f32 %v1735_v31, %v562_v27 }
 0x1fc   : > { %v814_v16 = vpop.permute.xlu1 %813  ;;  %v812_v30 = vpop.permute.xlu0 %811  ;;  %v854_v56 = vmul.f32 %v1746_v37, %v613_v60  ;;  %v913_v31 = vmul.f32 %v1782_v58, %v561_v44  ;;  %v914_v43 = vmul.f32 %v1782_v58, %v562_v27 }
 0x1fd   : > { %v663_v39 = vadd.f32 %v1882_v53, %v643_v23  ;;  %v1962_v22 = vsel %vm762_vm7, %v812_v30, %v814_v16  ;;  %1050 = vrot.lane.b32.xlu1 %v1033_v20, %s1500_s23  ;;  %750 = vrot.lane.b32.xlu0 %v732_v24, %s1499_s22 }
 0x1ff   : > { %v687_v61 = vadd.f32 %v683_v32, %v663_v39 }
 0x200   : > { %v995_v49 = vpop.permute.xlu1 %994  ;;  %v993_v28 = vpop.permute.xlu0 %992 }
 0x201   : > { %v1972_v53 = vsel %vm943_vm8, %v993_v28, %v995_v49  ;;  %871 = vrot.lane.b32.xlu0 %v853_v46, %s1499_s22  ;;  %752 = vrot.lane.b32.xlu1 %v733_v41, %s1499_s22  ;;  %v1976_v63 = vadd.f32 %v707_v40, %v687_v61  ;;  %v685_v41 = vmul.f32 %v1896_v4, %v1844_v25 }
 0x204   : > { %v519_v42 = vpop.permute.xlu1 %518  ;;  %v535_v0 = vpop.permute.xlu0 %534 }
 0x205   : > { %v553_v1 = vsel %vm538_vm0, %v519_v42, %v535_v0  ;;  %931 = vrot.lane.b32.xlu0 %v913_v31, %s1500_s23  ;;  %873 = vrot.lane.b32.xlu1 %v854_v56, %s1499_s22  ;;  %v541_v11 = vsel %vm538_vm0, %v535_v0, %v519_v42 }
 0x206   : > { %v563_v3 = vsel %vm508_vm2, %v553_v1, 0.0 }
 0x207   : > { %v644_v37 = vmul.f32 %v1900_v8, %v563_v3  ;;  %v1035_v8 = vmul.f32 %v1874_v48, %v613_v60  ;;  %v734_v19 = vmul.f32 %v1739_v33, %v563_v3  ;;  %v915_v32 = vmul.f32 %v1871_v45, %v563_v3 }
 0x208   : > { %v580_v54 = vpop.permute.xlu1 %579  ;;  %v578_v10 = vpop.permute.xlu0 %577 }
 0x209   : > { %v664_v36 = vadd.f32 %v1888_v57, %v644_v37  ;;  %v588_v14 = vsel %vm585_vm4, %v578_v10, %v580_v54  ;;  %1052 = vrot.lane.b32.xlu0 %v1034_v47, %s1500_s23  ;;  %933 = vrot.lane.b32.xlu1 %v914_v43, %s1500_s23  ;;  %v564_v57 = vsel %vm509_vm3, %v541_v11, 0.0  ;;  %v604_v23 = vsel %vm585_vm4, %v580_v54, %v578_v10 }
 0x20a   : > { %v614_v58 = vsel %vm567_vm5, %v588_v14, 0.0  ;;  %v735_v55 = vmul.f32 %v1739_v33, %v564_v57 }
 0x20b   : > { %v708_v18 = vmul.f32 %v1898_v7, %v614_v58  ;;  %v688_v20 = vadd.f32 %v684_v9, %v664_v36  ;;  %v855_v48 = vmul.f32 %v1816_v13, %v614_v58  ;;  %v615_v7 = vsel %vm568_vm6, %v604_v23, 0.0 }
 0x20c   : > { %v537_v44 = vpop.permute.xlu1 %536  ;;  %v582_v24 = vpop.permute.xlu0 %581  ;;  %v856_v30 = vmul.f32 %v1816_v13, %v615_v7  ;;  %v1036_v60 = vmul.f32 %v1878_v50, %v614_v58  ;;  %v1037_v4 = vmul.f32 %v1878_v50, %v615_v7 }
 0x20d   : > { %1054 = vrot.lane.b32.xlu1 %v1035_v8, %s1500_s23  ;;  %754 = vrot.lane.b32.xlu0 %v734_v19, %s1499_s22  ;;  %v2006_v21 = vadd.f32 %v708_v18, %v688_v20 }
 0x210   : > { %v521_v26 = vpop.permute.xlu1 %520  ;;  %v816_v46 = vpop.permute.xlu0 %815 }
 0x211   : > { %v554_v27 = vsel %vm538_vm0, %v521_v26, %v537_v44  ;;  %756 = vrot.lane.b32.xlu1 %v735_v55, %s1499_s22  ;;  %875 = vrot.lane.b32.xlu0 %v855_v48, %s1499_s22  ;;  %v542_v28 = vsel %vm538_vm0, %v537_v44, %v521_v26 }
 0x212   : > { %v565_v16 = vsel %vm508_vm2, %v554_v27, 0.0 }
 0x213   : > { %v645_v33 = vmul.f32 %v1880_v51, %v565_v16  ;;  %v916_v51 = vmul.f32 %v1871_v45, %v564_v57  ;;  %v736_v45 = vmul.f32 %v1741_v35, %v565_v16  ;;  %v917_v37 = vmul.f32 %v1823_v17, %v565_v16 }
 0x214   : > { %v584_v34 = vpop.permute.xlu1 %583  ;;  %v997_v12 = vpop.permute.xlu0 %996 }
 0x215   : > { %v665_v39 = vadd.f32 %v1893_v62, %v645_v33  ;;  %v589_v40 = vsel %vm585_vm4, %v582_v24, %v584_v34  ;;  %877 = vrot.lane.b32.xlu1 %v856_v30, %s1499_s22  ;;  %935 = vrot.lane.b32.xlu0 %v915_v32, %s1500_s23  ;;  %v605_v42 = vsel %vm585_vm4, %v584_v34, %v582_v24 }
 0x216   : > { %v616_v13 = vsel %vm567_vm5, %v589_v40, 0.0  ;;  %v617_v3 = vsel %vm568_vm6, %v605_v42, 0.0 }
 0x217   : > { %v709_v61 = vmul.f32 %v1890_v59, %v616_v13  ;;  %v689_v49 = vadd.f32 %v685_v41, %v665_v39  ;;  %v566_v59 = vsel %vm509_vm3, %v542_v28, 0.0  ;;  %v857_v50 = vmul.f32 %v1796_v2, %v616_v13 }
 0x218   : > { %v818_v62 = vpop.permute.xlu1 %817  ;;  %v737_v1 = vmul.f32 %v1741_v35, %v566_v59  ;;  %v858_v43 = vmul.f32 %v1796_v2, %v617_v3  ;;  %v918_v47 = vmul.f32 %v1823_v17, %v566_v59  ;;  %v1038_v35 = vmul.f32 %v1857_v29, %v616_v13  ;;  %v1083_v2 = vld [vmem:[%s2178_s6] sm:$0xf]  ;;  %v2071_v17 = vpop.permute.xlu0 %819 }
 0x219   : > { %v2033_v56 = vsel %vm762_vm7, %v816_v46, %v818_v62  ;;  %937 = vrot.lane.b32.xlu1 %v916_v51, %s1500_s23  ;;  %1056 = vrot.lane.b32.xlu0 %v1036_v60, %s1500_s23  ;;  %v2037_v25 = vadd.f32 %v709_v61, %v689_v49  ;;  %v1039_v15 = vmul.f32 %v1857_v29, %v617_v3 }
 0x21c   : > { %v999_v31 = vpop.permute.xlu1 %998  ;;  %v2075_v11 = vpop.permute.xlu0 %1000 }
 0x21d   : > { %v2045_v0 = vsel %vm943_vm8, %v997_v12, %v999_v31  ;;  %1058 = vrot.lane.b32.xlu1 %v1037_v4, %s1500_s23  ;;  %758 = vrot.lane.b32.xlu0 %v736_v45, %s1499_s22 }
 0x220   : > { %v2069_v54 = vpop.permute.xlu1 %821 }
 0x221   : > { %760 = vrot.lane.b32.xlu1 %v737_v1, %s1499_s22  ;;  %879 = vrot.lane.b32.xlu0 %v857_v50, %s1499_s22 }
 0x224   : > { %v2073_v10 = vpop.permute.xlu1 %1002 }
 0x225   : > { %881 = vrot.lane.b32.xlu1 %v858_v43, %s1499_s22  ;;  %939 = vrot.lane.b32.xlu0 %v917_v37, %s1500_s23  ;;  %s2119_s22 = scalar_lea.hbm %s2179_s7, %s1259_s17 }
 0x229   : > { %941 = vrot.lane.b32.xlu1 %v918_v47, %s1500_s23  ;;  %1060 = vrot.lane.b32.xlu0 %v1038_v35, %s1500_s23 }
 0x22d   : > { %1062 = vrot.lane.b32.xlu1 %v1039_v15, %s1500_s23  ;;  %1086 = vperm.xlu0 %1388, %v1083_v2   ;;  %s1391_s23 = scalar_lea.vmem %s2121_s20, 64 }
 0x22e   : > { %p1392_p2 = scmp.ne.s32.totalorder %s2121_s20, %s1391_s23  ;;  %p1399_p7 = scmp.lt.s32.totalorder %s1397_s13, %s1391_s23 }
 0x230   : > { %p1393_p4 = pnand %p1392_p2, %p1595_p3  ;;  %p1400_p9 = por %p1399_p7, %p1398_p6 }
 0x232   : > { %p1394_p5 = pneg %p1393_p4 }
 0x234   : > { %p1401_p10 = pnand %p1400_p9, %p1394_p5 }
 0x25f   : > { %v747_v36 = vpop.permute.xlu1 %746 }
 0x263   : > { %v749_v14 = vpop.permute.xlu1 %748  ;;  %v868_v9 = vpop.permute.xlu0 %867 }
 0x264   : > { %v763_v58 = vsel %vm762_vm7, %v747_v36, %v749_v14 }
 0x265   : > { %v771_v8 = vadd.f32 %v763_v58, %v1929_v5 }
 0x267   : > { %v870_v18 = vpop.permute.xlu1 %869  ;;  %v831_v29 = vadd.f32 %v1934_v6, %v771_v8  ;;  %v928_v19 = vpop.permute.xlu0 %927 }
 0x268   : > { %v883_v57 = vsel %vm762_vm7, %v868_v9, %v870_v18 }
 0x269   : > { %v891_v44 = vadd.f32 %v883_v57, %v831_v29 }
 0x26b   : > { %v930_v20 = vpop.permute.xlu1 %929  ;;  %v1049_v23 = vpop.permute.xlu0 %1048 }
 0x26c   : > { %v944_v55 = vsel %vm943_vm8, %v928_v19, %v930_v20 }
 0x26d   : > { %v952_v48 = vadd.f32 %v944_v55, %v891_v44 }
 0x26f   : > { %v1051_v7 = vpop.permute.xlu1 %1050  ;;  %v1012_v24 = vadd.f32 %v1942_v38, %v952_v48  ;;  %v751_v26 = vpop.permute.xlu0 %750 }
 0x270   : > { %v1064_v46 = vsel %vm943_vm8, %v1049_v23, %v1051_v7 }
 0x271   : > { %v1072_v51 = vadd.f32 %v1064_v46, %v1012_v24 }
 0x273   : > { %v753_v27 = vpop.permute.xlu1 %752  ;;  %v872_v16 = vpop.permute.xlu0 %871 }
 0x274   : > { %v764_v5 = vsel %vm762_vm7, %v751_v26, %v753_v27 }
 0x275   : > { %v772_v30 = vadd.f32 %v764_v5, %v1976_v63 }
 0x277   : > { %v874_v6 = vpop.permute.xlu1 %873  ;;  %v832_v33 = vadd.f32 %v1962_v22, %v772_v30  ;;  %v932_v32 = vpop.permute.xlu0 %931  ;;  %v1076_v22 = vmax.f32 %v1072_v51, 0.0 }
 0x278   : > { %v884_v34 = vsel %vm762_vm7, %v872_v16, %v874_v6  ;;  %v1082_v16 = vld [vmem:[%s2177_s5] sm:$0x3] }
 0x279   : > { %v892_v39 = vadd.f32 %v884_v34, %v832_v33 }
 0x27b   : > { %v934_v40 = vpop.permute.xlu1 %933  ;;  %v1053_v41 = vpop.permute.xlu0 %1052 }
 0x27c   : > { %v945_v38 = vsel %vm943_vm8, %v932_v32, %v934_v40 }
 0x27d   : > { %v953_v13 = vadd.f32 %v945_v38, %v892_v39 }
 0x27f   : > { %v1055_v61 = vpop.permute.xlu1 %1054  ;;  %v1013_v60 = vadd.f32 %v1972_v53, %v953_v13  ;;  %v755_v62 = vpop.permute.xlu0 %754 }
 0x280   : > { %v1065_v63 = vsel %vm943_vm8, %v1053_v41, %v1055_v61 }
 0x281   : > { %v1073_v49 = vadd.f32 %v1065_v63, %v1013_v60 }
 0x283   : > { %v1077_v28 = vmax.f32 %v1073_v49, 0.0  ;;  %v757_v4 = vpop.permute.xlu1 %756  ;;  %v876_v45 = vpop.permute.xlu0 %875 }
 0x284   : > { %v765_v59 = vsel %vm762_vm7, %v755_v62, %v757_v4 }
 0x285   : > { %v773_v12 = vadd.f32 %v765_v59, %v2006_v21  ;;  %v1080_v31 = vpack.c.bf16 %v1077_v28, %v1076_v22 }
 0x287   : > { %v878_v42 = vpop.permute.xlu1 %877  ;;  %v833_v1 = vadd.f32 %v2033_v56, %v773_v12  ;;  %1266 = vmatpush3.bf16.msra.mxu1 %v1080_v31  ;;  %v936_v50 = vpop.permute.xlu0 %935 }
 0x288   : > { %v885_v53 = vsel %vm762_vm7, %v876_v45, %v878_v42  ;;  %1267 = vmatprep.subr.bf16.mxu1 %v1501_v52  ;;  %v826_v52 = vsel %vm762_vm7, %v2071_v17, %v2069_v54 }
 0x289   : > { %v893_v3 = vadd.f32 %v885_v53, %v833_v1 }
 0x28b   : > { %v938_v43 = vpop.permute.xlu1 %937  ;;  %v1057_v37 = vpop.permute.xlu0 %1056 }
 0x28c   : > { %v946_v47 = vsel %vm943_vm8, %v936_v50, %v938_v43 }
 0x28d   : > { %v954_v35 = vadd.f32 %v946_v47, %v893_v3 }
 0x28f   : > { %v1059_v2 = vpop.permute.xlu1 %1058  ;;  %v1014_v15 = vadd.f32 %v2045_v0, %v954_v35  ;;  %v759_v21 = vpop.permute.xlu0 %758 }
 0x290   : > { %v1066_v0 = vsel %vm943_vm8, %v1057_v37, %v1059_v2 }
 0x291   : > { %v1074_v23 = vadd.f32 %v1066_v0, %v1014_v15 }
 0x293   : > { %v761_v36 = vpop.permute.xlu1 %760  ;;  %v880_v14 = vpop.permute.xlu0 %879  ;;  %v1078_v24 = vmax.f32 %v1074_v23, 0.0 }
 0x294   : > { %v766_v56 = vsel %vm762_vm7, %v759_v21, %v761_v36 }
 0x295   : > { %v774_v9 = vadd.f32 %v766_v56, %v2037_v25  ;;  %v1007_v25 = vsel %vm943_vm8, %v2075_v11, %v2073_v10 }
 0x297   : > { %v882_v58 = vpop.permute.xlu1 %881  ;;  %v834_v8 = vadd.f32 %v826_v52, %v774_v9  ;;  %v940_v29 = vpop.permute.xlu0 %939 }
 0x298   : > { %v886_v18 = vsel %vm762_vm7, %v880_v14, %v882_v58 }
 0x299   : > { %v894_v19 = vadd.f32 %v886_v18, %v834_v8 }
 0x29b   : > { %v942_v57 = vpop.permute.xlu1 %941  ;;  %v1061_v54 = vpop.permute.xlu0 %1060 }
 0x29c   : > { %v947_v44 = vsel %vm943_vm8, %v940_v29, %v942_v57 }
 0x29d   : > { %v955_v20 = vadd.f32 %v947_v44, %v894_v19 }
 0x29f   : > { %v1063_v17 = vpop.permute.xlu1 %1062  ;;  %v1015_v55 = vadd.f32 %v1007_v25, %v955_v20 }
 0x2a0   : > { %v1067_v48 = vsel %vm943_vm8, %v1061_v54, %v1063_v17 }
 0x2a1   : > { %v1075_v7 = vadd.f32 %v1067_v48, %v1015_v55 }
 0x2a3   : > { %v1079_v26 = vmax.f32 %v1075_v7, 0.0 }
 0x2a5   : > { %v1081_v27 = vpack.c.bf16 %v1079_v26, %v1078_v24 }
 0x2a7   : > { %1268 = vmatpush3.bf16.msra.mxu1 %v1081_v27 }
 0x2aa   : > { %1270 = vmatmul.mubr.msk.bf16.vlgmr.msra.gmra.mrb[0].mxu1 %vm346_vm1, %v1082_v16 }
 0x2ac   : > { %v1087_v10 = vpop.permute.xlu0 %1086 }
 0x37d   : > { %v1126_v11 = vpop.f32.mrb[0].mxu1 }
 0x37e   : > { %v1127_v5 = vadd.f32 %v1126_v11, %v1087_v10  ;;  %v1271_v30 = vpop.f32.mrb[1].mxu1 }
 0x37f   : > { %v1129_v6 = vpop.f32.mrb[2].mxu1 }
 0x380   : > { %1132 = vst [vmem:[%s316_s18] sm:$0xf] %v1127_v5  ;;  %v1272_v33 = vpop.f32.mrb[3].mxu1 }
 0x381   : > { %1404 = shalt.err (!%p1401_p10)
}
 0x382   : > { %s1405_s11 = scalar_lea.hbm %s2119_s22, 64  ;;  %s1409_s17 = scalar_lea.hbm %s2179_s7, 256 }
 0x383   : > { %p1406_p11 = scmp.ne.s32.totalorder %s2119_s22, %s1405_s11  ;;  %p1410_p0 = scmp.lt.u32.totalorder %s2119_s22, %s2179_s7 }
 0x384   : > { %p1411_p1 = scmp.lt.u32.totalorder %s1409_s17, %s1405_s11  ;;  %p1413_p4 = scmp.lt.u32.totalorder %s1405_s11, %s2119_s22 }
 0x385   : > { %p1407_p12 = pnand %p1406_p11, %p1595_p3 }
 0x386   : > { %p1412_p2 = por %p1411_p1, %p1410_p0 }
 0x387   : > { %p1408_p13 = pneg %p1407_p12 }
 0x388   : > { %p1414_p5 = por %p1413_p4, %p1412_p2 }
 0x38a   : > { %p1415_p6 = pnand %p1414_p5, %p1408_p13 }
 0x38c   : > { %1418 = shalt.err (!%p1415_p6)
}
 0x38d   : > { %1273 = dma.vmem_to_hbm [thread:$0]  (%p1595_p3), %s2121_s20, 64, %s2119_s22, %s1134_s9  }
 0x38e PF: > { %p1279_p7 = scmp.ge.s32.totalorder %s1485_s8, 2  ;;  %s1161_s21 = sand.u32 1, %s1457_s24  }
 0x38f   : > { %s1162_s23 = scalar_lea.sflag [#allocation3], %s1161_s21 }
 0x390   : > { %p1276_p9 = pnand %p1279_p7, %p1604_p8 }
 0x392   : > { %1452 = dma.done.wait (!%p1276_p9), %s1162_s23, 64  }
 0x393   : > { %1454 = vsyncadd (!%p1276_p9), %s1162_s23, 4294967232  ;;  %s20_s8 = sadd.s32 1, %s1485_s8   ;;  %s2190_s14 = sld [smem:[#allocation5_spill]] }
 0x394   : > { %p17_p10 = scmp.ge.s32.totalorder %s20_s8, 6   ;;  %s2191_s20 = sld [smem:[#allocation6_spill]] }
 0x395   : > { %s2192_s24 = smov %s1461_s25  ;;  %s2193_s25 = smov %s1465_s26 }
 0x396   : > { %s2194_s26 = smov %s1613_s19  ;;  %s2195_s27 = smov %s1477_s29 }
 0x397   : > { %s2196_s28 = smov %s1481_s30  ;;  %19 = sbr.rel (!%p17_p10) target bundleno = 5 (0x5), region = 86 }
 0x399   : > { %s2197_s29 = smov %s2190_s14 }
 0x39a   : > { %s2198_s30 = smov %s2191_s20 }
 0x39e   :  { %1167 = vsyncpa [#allocation3], 1 }
 0x39f   :  { %1169 = vsyncpa [#allocation3 + $0x1], 1 }

</bundles_post_ra>
